<compile_context>
chip_gen: v6e
topology: v6e:2x2x1
jax: 0.10.0
libtpu: 0.0.40
codegen_flags: <defaults>
</compile_context>

<pallas_src>
import functools
import math

import jax
import jax.numpy as jnp
from jax.experimental import pallas as pl
from jax.experimental.pallas import tpu as pltpu


def _round_up(a, b):
    return ((a + b - 1) // b) * b


def _quantize(t, num_bits, min_val=-1.0, max_val=1.0):
    levels = float(2 ** num_bits - 1)
    scale = (max_val - min_val) / levels
    inv_scale = levels / (max_val - min_val)
    return jnp.round((t - min_val) * inv_scale) * scale + min_val


def _binarize_linear_kernel(x_ref, w_ref, b_ref, o_ref, acc_ref, *,
                            precision_a, comp):
    k = pl.program_id(2)

    @pl.when(k == 0)
    def _():
        acc_ref[...] = jnp.zeros_like(acc_ref)

    # Activation quantization (VPU). scale / inv_scale are Python constants so
    # this is round + multiply, no vector divide.
    levels = float(2 ** precision_a - 1)
    scale = 2.0 / levels          # (max - min) / (2^b - 1), min=-1, max=1
    inv_scale = levels / 2.0
    x = x_ref[...]
    q = jnp.round((x + 1.0) * inv_scale)
    if comp:
        xq = q * scale - 1.0                  # Quantize(x)
    else:
        xq = q * (0.5 * scale)                # (Quantize(x) + 1) * 0.5  (fused)

    # Weight tile is already quantized + transposed to (K, N) by the wrapper:
    # plain [tm,tk] @ [tk,tn] straight into the MXU, f32 accumulation.
    acc_ref[...] += jnp.dot(xq, w_ref[...], preferred_element_type=jnp.float32)

    @pl.when(k == pl.num_programs(2) - 1)
    def _():
        o_ref[...] = (acc_ref[...] + b_ref[...]).astype(o_ref.dtype)


def binarize_linear_train(x, weight, bias, *, precision_w=3, precision_a=1,
                          comp=False, tm=256, tn=256, tk=512):
    """x: (B, in_features), weight: (out_features, in_features), bias: (out_features,)"""
    # TODO(synk): the PyTorch module's `.org` clone bookkeeping and in-place
    # `input.data` mutation are training-state side effects with no Pallas
    # equivalent; only the forward math is implemented.
    M, K = x.shape
    N = weight.shape[0]

    # Quantize the weight once in the wrapper (parameter, reused across the
    # whole batch) and pre-transpose to (K, N): no in-kernel transpose and no
    # re-quantization per M grid step.
    wq_t = _quantize(weight.astype(jnp.float32), precision_w).T  # (K, N)

    # Clamp tile sizes to (8, 128)-aligned padded dims, then pad every operand
    # so the grid divides evenly and the output is lane-dense (N % 128 == 0).
    tm = min(tm, _round_up(M, 8))
    tk = min(tk, _round_up(K, 128))
    tn = min(tn, _round_up(N, 128))
    M_pad = _round_up(M, tm)
    K_pad = _round_up(K, tk)
    N_pad = _round_up(N, tn)

    # Padded K columns of x may quantize to nonzero values inside the kernel,
    # but they multiply zero-padded (quantized) weight rows, so they contribute
    # exactly 0. Padded M rows / N cols are sliced off at the end.
    x_p = jnp.pad(x.astype(jnp.float32), ((0, M_pad - M), (0, K_pad - K)))
    w_p = jnp.pad(wq_t, ((0, K_pad - K), (0, N_pad - N)))
    b_p = jnp.pad(bias.astype(jnp.float32), (0, N_pad - N)).reshape(1, N_pad)

    grid = (M_pad // tm, N_pad // tn, K_pad // tk)

    kernel = functools.partial(_binarize_linear_kernel,
                               precision_a=precision_a, comp=comp)

    out = pl.pallas_call(
        kernel,
        out_shape=jax.ShapeDtypeStruct((M_pad, N_pad), jnp.float32),
        grid_spec=pltpu.PrefetchScalarGridSpec(
            num_scalar_prefetch=0,
            grid=grid,
            in_specs=[
                pl.BlockSpec((tm, tk), lambda i, j, k: (i, k)),   # x
                pl.BlockSpec((tk, tn), lambda i, j, k: (k, j)),   # quantized W^T
                pl.BlockSpec((1, tn), lambda i, j, k: (0, j)),    # bias
            ],
            out_specs=pl.BlockSpec((tm, tn), lambda i, j, k: (i, j)),
            scratch_shapes=[pltpu.VMEM((tm, tn), jnp.float32)],
        ),
        compiler_params=pltpu.CompilerParams(
            dimension_semantics=("parallel", "parallel", "arbitrary")),
    )(x_p, w_p, b_p)

    return out[:M, :N]


def reference(x, weight, bias, *, precision_w=3, precision_a=1, comp=False):
    xq = _quantize(x, precision_a)
    if not comp:
        xq = (xq + 1.0) * 0.5
    wq = _quantize(weight, precision_w)
    return xq @ wq.T + bias[None, :]


if __name__ == "__main__":
    # Small, 784-free shapes so the quantization branch is exercised.
    batch, in_features, out_features = 8, 32, 16

    key = jax.random.PRNGKey(0)
    kx, kw, kb = jax.random.split(key, 3)

    # Deterministic parameter init mirroring reset_parameters():
    #   kaiming_uniform_(a=sqrt(5)) -> U(-1/sqrt(fan_in), 1/sqrt(fan_in))
    fan_in = in_features
    bound = 1.0 / math.sqrt(fan_in)
    weight = jax.random.uniform(kw, (out_features, in_features),
                                minval=-bound, maxval=bound, dtype=jnp.float32)
    bias = jax.random.uniform(kb, (out_features,),
                              minval=-bound, maxval=bound, dtype=jnp.float32)

    x = jax.random.uniform(kx, (batch, in_features),
                           minval=-1.0, maxval=1.0, dtype=jnp.float32)

    out = binarize_linear_train(x, weight, bias)
    out = jax.block_until_ready(out)

    ref = reference(x, weight, bias)
    assert out.shape == (batch, out_features)
    assert jnp.allclose(out, ref, atol=1e-5, rtol=1e-5), \
        f"max abs err {jnp.max(jnp.abs(out - ref))}"

    print("KERNEL_OK")
</pallas_src>

<mosaic_0001>
module attributes {stable_mosaic.version = 11 : i64} {
  func.func @_binarize_linear_kernel(%arg0: i32, %arg1: i32, %arg2: i32, %arg3: memref<8x128xf32, #tpu.memory_space<vmem>>, %arg4: memref<128x128xf32, #tpu.memory_space<vmem>>, %arg5: memref<1x128xf32, #tpu.memory_space<vmem>>, %arg6: memref<8x128xf32, #tpu.memory_space<vmem>>, %arg7: memref<8x128xf32, #tpu.memory_space<vmem>>) attributes {dimension_semantics = [#tpu.dimension_semantics<parallel>, #tpu.dimension_semantics<parallel>, #tpu.dimension_semantics<arbitrary>], iteration_bounds = array<i64: 1, 1, 1>, scalar_prefetch = 0 : i64, scratch_operands = 1 : i64, tpu.core_type = #tpu.core_type<tc>, window_params = [{transform_indices = @transform_0, window_bounds = array<i64: 8, 128>}, {transform_indices = @transform_1, window_bounds = array<i64: 128, 128>}, {transform_indices = @transform_2, window_bounds = array<i64: 1, 128>}, {transform_indices = @transform_3, window_bounds = array<i64: 8, 128>}]} {
    %c0_i32 = arith.constant 0 : i32
    %0 = arith.cmpi eq, %arg2, %c0_i32 : i32
    %1 = arith.extui %0 : i1 to i32
    %c0_i32_0 = arith.constant 0 : i32
    %2 = arith.cmpi ne, %1, %c0_i32_0 : i32
    scf.if %2 {
      %cst_13 = arith.constant 0.000000e+00 : f32
      %19 = vector.broadcast %cst_13 : f32 to vector<8x128xf32>
      %c0_14 = arith.constant 0 : index
      %c0_15 = arith.constant 0 : index
      %20 = vector.load %arg7[%c0_14, %c0_15] : memref<8x128xf32, #tpu.memory_space<vmem>>, vector<8x128xf32>
      tpu.vector_store %arg7[%c0_14, %c0_15], %19 {strides = array<i32>} : memref<8x128xf32, #tpu.memory_space<vmem>>, vector<8x128xf32>,
    } else {
    }
    %c0 = arith.constant 0 : index
    %c0_1 = arith.constant 0 : index
    %3 = vector.load %arg3[%c0, %c0_1] : memref<8x128xf32, #tpu.memory_space<vmem>>, vector<8x128xf32>
    %cst = arith.constant 1.000000e+00 : f32
    %4 = vector.broadcast %cst : f32 to vector<8x128xf32>
    %5 = arith.addf %3, %4 : vector<8x128xf32>
    %cst_2 = arith.constant 5.000000e-01 : f32
    %6 = vector.broadcast %cst_2 : f32 to vector<8x128xf32>
    %7 = arith.mulf %5, %6 : vector<8x128xf32>
    %8 = math.roundeven %7 : vector<8x128xf32>
    %cst_3 = arith.constant 1.000000e+00 : f32
    %9 = vector.broadcast %cst_3 : f32 to vector<8x128xf32>
    %10 = arith.mulf %8, %9 : vector<8x128xf32>
    %c0_4 = arith.constant 0 : index
    %c0_5 = arith.constant 0 : index
    %11 = vector.load %arg7[%c0_4, %c0_5] : memref<8x128xf32, #tpu.memory_space<vmem>>, vector<8x128xf32>
    %c0_6 = arith.constant 0 : index
    %c0_7 = arith.constant 0 : index
    %12 = vector.load %arg4[%c0_6, %c0_7] : memref<128x128xf32, #tpu.memory_space<vmem>>, vector<128x128xf32>
    %cst_8 = arith.constant dense<0.000000e+00> : vector<8x128xf32>
    %13 = tpu.matmul %10, %12, %cst_8 {dimension_numbers = #tpu.dot_dimension_numbers<[1], [0], [0], [1], [0, 0, 1, 1], [], []>} : vector<8x128xf32>, vector<128x128xf32>, vector<8x128xf32> -> vector<8x128xf32>
    %14 = arith.addf %11, %13 : vector<8x128xf32>
    %c0_9 = arith.constant 0 : index
    %c0_10 = arith.constant 0 : index
    %15 = vector.load %arg7[%c0_9, %c0_10] : memref<8x128xf32, #tpu.memory_space<vmem>>, vector<8x128xf32>
    tpu.vector_store %arg7[%c0_9, %c0_10], %14 {strides = array<i32>} : memref<8x128xf32, #tpu.memory_space<vmem>>, vector<8x128xf32>,
    %c0_i32_11 = arith.constant 0 : i32
    %16 = arith.cmpi eq, %arg2, %c0_i32_11 : i32
    %17 = arith.extui %16 : i1 to i32
    %c0_i32_12 = arith.constant 0 : i32
    %18 = arith.cmpi ne, %17, %c0_i32_12 : i32
    scf.if %18 {
      %c0_13 = arith.constant 0 : index
      %c0_14 = arith.constant 0 : index
      %19 = vector.load %arg7[%c0_13, %c0_14] : memref<8x128xf32, #tpu.memory_space<vmem>>, vector<8x128xf32>
      %c0_15 = arith.constant 0 : index
      %c0_16 = arith.constant 0 : index
      %20 = vector.load %arg5[%c0_15, %c0_16] : memref<1x128xf32, #tpu.memory_space<vmem>>, vector<1x128xf32>
      %21 = vector.broadcast %20 : vector<1x128xf32> to vector<8x128xf32>
      %22 = arith.addf %19, %21 : vector<8x128xf32>
      %c0_17 = arith.constant 0 : index
      %c0_18 = arith.constant 0 : index
      %23 = vector.load %arg6[%c0_17, %c0_18] : memref<8x128xf32, #tpu.memory_space<vmem>>, vector<8x128xf32>
      tpu.vector_store %arg6[%c0_17, %c0_18], %22 {strides = array<i32>} : memref<8x128xf32, #tpu.memory_space<vmem>>, vector<8x128xf32>,
    } else {
    }
    return
  }
  func.func @transform_0(%arg0: i32, %arg1: i32, %arg2: i32) -> (i32, i32) {
    %c0_i32 = arith.constant 0 : i32
    return %arg0, %arg2 : i32, i32
  }
  func.func @transform_1(%arg0: i32, %arg1: i32, %arg2: i32) -> (i32, i32) {
    %c0_i32 = arith.constant 0 : i32
    return %arg2, %arg1 : i32, i32
  }
  func.func @transform_2(%arg0: i32, %arg1: i32, %arg2: i32) -> (i32, i32) {
    %c0_i32 = arith.constant 0 : i32
    %c0_i32_0 = arith.constant 0 : i32
    return %c0_i32, %arg1 : i32, i32
  }
  func.func @transform_3(%arg0: i32, %arg1: i32, %arg2: i32) -> (i32, i32) {
    %c0_i32 = arith.constant 0 : i32
    return %arg0, %arg1 : i32, i32
  }
}

</mosaic_0001>

<bundles_post_ra>
// kernel: tpu_custom_call.1
= control target key start
LH: loop header
LB: loop body
LE: loop exit
PB: predicated region body
PF: predicated region fallthrough
CT: control target
= control target key end

     0   :  { %8 = vsyncpa [#allocation4], 0  ;;  %s341_s0 = inlined_call_operand.hbm [shape: f32[8,128], index: 0, kind: input, shape index: {}]   ;;  %s342_s1 = inlined_call_operand.hbm [shape: f32[128,128], index: 1, kind: input, shape index: {}]   ;;  %s343_s2 = inlined_call_operand.vmem [shape: f32[1,128], index: 2, kind: input, shape index: {}]   ;;  %s344_s3 = inlined_call_operand.hbm [shape: f32[8,128], index: 3, kind: output, shape index: {}]  }
   0x1   :  { %9 = vsyncpa [#allocation7], 0 }
   0x2   :  { %10 = vsyncpa [#allocation5], 0  ;;  %s302_s12 = smov [#allocation3]   ;;  %s303_s14 = smov [#allocation6]  }
   0x3   :  { %s17_s13 = sshll.u32 %s302_s12, 4  ;;  %s26_s15 = sshll.u32 %s303_s14, 4  ;;  %s18_s13 = int_to_ptr.vmem [resolvable:$true] %s17_s13  ;;  %s27_s15 = int_to_ptr.vmem [resolvable:$true] %s26_s15 }
   0x4   :  { %s244_s16 = scalar_lea.vmem %s18_s13, 128  ;;  %p249_p1 = scmp.lt.s32.totalorder %s18_s13, %s18_s13 }
   0x5   :  { %p245_p0 = scmp.ne.s32.totalorder %s18_s13, %s244_s16  ;;  %p250_p2 = scmp.lt.s32.totalorder %s244_s16, %s244_s16 }
   0x7   :  { %p251_p3 = por %p250_p2, %p249_p1 }
   0x9   :  { %p252_p4 = pnand %p251_p3, %p245_p0 }
   0xb   :  { %255 = shalt.err (!%p252_p4)
}
   0xc   :  { %20 = dma.hbm_to_vmem [thread:$0]  %s341_s0, 128, %s18_s13, [#allocation4]  }
   0xd   :  { %s264_s19 = scalar_lea.vmem %s27_s15, 2048  ;;  %p269_p6 = scmp.lt.s32.totalorder %s27_s15, %s27_s15 }
   0xe   :  { %p265_p5 = scmp.ne.s32.totalorder %s27_s15, %s264_s19  ;;  %p270_p7 = scmp.lt.s32.totalorder %s264_s19, %s264_s19 }
  0x10   :  { %p271_p8 = por %p270_p7, %p269_p6 }
  0x12   :  { %p272_p9 = pnand %p271_p8, %p265_p5 }
  0x14   :  { %275 = shalt.err (!%p272_p9)
}
  0x15   :  { %s304_s20 = smov 128   ;;  %s305_s21 = smov 8  }
  0x16   :  { %32 = dma.hbm_to_vmem [thread:$0]  %s342_s1, 2048, %s27_s15, [#allocation7], %s304_s20, %s304_s20, %s305_s21  }
  0x17   :  { %296 = dma.done.wait [#allocation4], 128  }
  0x18   :  { %297 = vsyncadd [#allocation4], 4294967168 }
  0x19   :  { %298 = dma.done.wait [#allocation7], 2048  }
  0x1a   :  { %299 = vsyncadd [#allocation7], 4294965248  ;;  %v306_v0 = vmov 0.0   ;;  %vm307_vm0 = vmmov 0   ;;  %v66_v1 = vld [vmem:[#allocation6 + $0x78] sm:$0xff]  ;;  %v65_v2 = vld [vmem:[#allocation6 + $0x70] sm:$0xff] }
  0x1b   :  { %186 = vmatprep.subr.mxu0 %v306_v0  ;;  %218 = vmatprep.mubr.msk.f32.mxu0 %vm307_vm0, %v306_v0  ;;  %v64_v3 = vld [vmem:[#allocation6 + $0x68] sm:$0xff]  ;;  %v63_v4 = vld [vmem:[#allocation6 + $0x60] sm:$0xff]  ;;  %v46_v5 = vld [vmem:[#allocation3] sm:$0xff]  ;;  %s308_s24 = smov [#allocation8]  }
  0x1c   :  { %187 = vmatpush3.msra.mxu0 %v66_v1  ;;  %v62_v6 = vld [vmem:[#allocation6 + $0x58] sm:$0xff]  ;;  %v47_v7 = vadd.f32 1.0, %v46_v5  ;;  %v61_v8 = vld [vmem:[#allocation6 + $0x50] sm:$0xff]  ;;  %v60_v10 = vld [vmem:[#allocation6 + $0x48] sm:$0xff]  ;;  %s158_s25 = sshll.u32 %s308_s24, 4  ;;  %s159_s25 = int_to_ptr.vmem [resolvable:$true] %s158_s25 }
  0x1d   :  { %188 = vmatprep.subr.mxu0 %v306_v0  ;;  %v59_v11 = vld [vmem:[#allocation6 + $0x40] sm:$0xff]  ;;  %v58_v13 = vld [vmem:[#allocation6 + $0x38] sm:$0xff]  ;;  %v57_v14 = vld [vmem:[#allocation6 + $0x30] sm:$0xff]  ;;  %s276_s26 = scalar_lea.vmem %s159_s25, 128  ;;  %p281_p11 = scmp.lt.s32.totalorder %s159_s25, %s159_s25 }
  0x1e   :  { %189 = vmatpush3.msra.mxu0 %v65_v2  ;;  %v48_v9 = vmul.f32 0.5, %v47_v7  ;;  %v56_v16 = vld [vmem:[#allocation6 + $0x28] sm:$0xff]  ;;  %v55_v17 = vld [vmem:[#allocation6 + $0x20] sm:$0xff]  ;;  %v54_v20 = vld [vmem:[#allocation6 + $0x18] sm:$0xff]  ;;  %p277_p10 = scmp.ne.s32.totalorder %s159_s25, %s276_s26  ;;  %p282_p12 = scmp.lt.s32.totalorder %s276_s26, %s276_s26 }
  0x1f   :  { %190 = vmatprep.subr.mxu0 %v306_v0  ;;  %v53_v22 = vld [vmem:[#allocation6 + $0x10] sm:$0xff]  ;;  %v52_v24 = vld [vmem:[#allocation6 + $0x8] sm:$0xff]  ;;  %v51_v25 = vld [vmem:[#allocation6] sm:$0xff] }
  0x20   :  { %191 = vmatpush3.msra.mxu0 %v64_v3  ;;  %v223_v12 = vcvt.f32.s32 %v48_v9  ;;  %v226_v19 = vand.u32 2147483648, %v48_v9  ;;  %v221_v21 = vand.u32 2147483647, %v48_v9  ;;  %v168_v27 = vld [vmem:[%s343_s2] ss:$0 sm:$0xff]  ;;  %p283_p13 = por %p282_p12, %p281_p11 }
  0x21   :  { %192 = vmatprep.subr.mxu0 %v306_v0 }
  0x22   :  { %193 = vmatpush3.msra.mxu0 %v63_v4  ;;  %v224_v15 = vcvt.s32.f32 %v223_v12  ;;  %vm222_vm1 = vcmp.lt.f32.partialorder %v221_v21, 8388608.0  ;;  %p284_p0 = pnand %p283_p13, %p277_p10 }
  0x23   :  { %194 = vmatprep.subr.mxu0 %v306_v0 }
  0x24   :  { %195 = vmatpush3.msra.mxu0 %v62_v6  ;;  %v225_v18 = vand.u32 2147483647, %v224_v15 }
  0x25   :  { %196 = vmatprep.subr.mxu0 %v306_v0 }
  0x26   :  { %197 = vmatpush3.msra.mxu0 %v61_v8  ;;  %v227_v23 = vor.u32 %v226_v19, %v225_v18 }
  0x27   :  { %198 = vmatprep.subr.mxu0 %v306_v0 }
  0x28   :  { %199 = vmatpush3.msra.mxu0 %v60_v10  ;;  %v228_v26 = vsel %vm222_vm1, %v227_v23, %v48_v9 }
  0x29   :  { %200 = vmatprep.subr.mxu0 %v306_v0 }
  0x2a   :  { %201 = vmatpush3.msra.mxu0 %v59_v11 }
  0x2b   :  { %202 = vmatprep.subr.mxu0 %v306_v0 }
  0x2c   :  { %203 = vmatpush3.msra.mxu0 %v58_v13 }
  0x2d   :  { %204 = vmatprep.subr.mxu0 %v306_v0 }
  0x2e   :  { %205 = vmatpush3.msra.mxu0 %v57_v14 }
  0x2f   :  { %206 = vmatprep.subr.mxu0 %v306_v0 }
  0x30   :  { %207 = vmatpush3.msra.mxu0 %v56_v16 }
  0x31   :  { %208 = vmatprep.subr.mxu0 %v306_v0 }
  0x32   :  { %209 = vmatpush3.msra.mxu0 %v55_v17 }
  0x33   :  { %210 = vmatprep.subr.mxu0 %v306_v0 }
  0x34   :  { %211 = vmatpush3.msra.mxu0 %v54_v20 }
  0x35   :  { %212 = vmatprep.subr.mxu0 %v306_v0 }
  0x36   :  { %213 = vmatpush3.msra.mxu0 %v53_v22 }
  0x37   :  { %214 = vmatprep.subr.mxu0 %v306_v0 }
  0x38   :  { %215 = vmatpush3.msra.mxu0 %v52_v24 }
  0x39   :  { %216 = vmatprep.subr.mxu0 %v306_v0 }
  0x3a   :  { %217 = vmatpush3.msra.mxu0 %v51_v25 }
  0x3b   :  { %219 = vmatmul.mubr.f32.vlgmr.msra.gmra.mxu0 %v228_v26 }
  0xfb   :  { %v133_v28 = vpop.f32.mrf.mxu0 }
  0xfc   :  { %v150_v29 = vadd.f32 %v168_v27, %v133_v28 }
  0xfd   :  { %v220_v30 = vpop.f32.mrf.mxu0 }
  0xfe   :  { %151 = vst [vmem:[#allocation8] sm:$0xff] %v150_v29 }
  0xff   :  { %287 = shalt.err (!%p284_p0)
}
 0x100   :  { %161 = dma.vmem_to_hbm [thread:$0]  %s159_s25, 128, %s344_s3, [#allocation5]  }
 0x101   :  { %300 = dma.done.wait [#allocation5], 128  }
 0x102   :  { %301 = vsyncadd [#allocation5], 4294967168 }
 0x103   :  { %165 = vsyncpa [#allocation4], 1 }
 0x104   :  { %166 = vsyncpa [#allocation7], 1 }
 0x105   :  { %167 = vsyncpa [#allocation5], 1 }

</bundles_post_ra>
